<compile_context>
chip_gen: v6e
topology: v6e:2x2x1
jax: 0.10.0
libtpu: 0.0.40
codegen_flags: <defaults>
</compile_context>

<pallas_src>
import jax
import jax.numpy as jnp
from jax.experimental import pallas as pl
from jax.experimental.pallas import tpu as pltpu


def _basic_block_kernel(x_ref, w_ref, sb_ref, o_ref, pad_ref):
    # x_ref  : (H, W*C)       f32   lane-dense input rows (also the identity)
    # w_ref  : (6, W*C, W*C)  bf16  block-banded conv weights:
    #                               [0..2] = conv1 dy=0..2, [3..5] = conv2 dy=0..2
    # sb_ref : (4, W*C)       f32   folded BN params [s1, b1, s2, b2], lane-tiled
    # o_ref  : (H, W*C)       f32   lane-dense output
    # pad_ref: (H+2, W*C)     bf16  H-halo scratch reused by both convs
    H, WC = o_ref.shape

    # Zero only the two halo rows (full-lane, unmasked stores).  The interior
    # is overwritten below and nothing else ever writes the halo rows.
    zrow = jnp.zeros((1, WC), jnp.bfloat16)
    pad_ref[0:1, :] = zrow
    pad_ref[H + 1:H + 2, :] = zrow

    x = x_ref[...]                                        # (H, WC) f32 identity

    def conv3x3(base):
        # 3 dy-row-shifted lane-dense MXU matmuls, bf16 operands, f32 accum.
        acc = jnp.zeros((H, WC), jnp.float32)
        for dy in range(3):
            acc += jnp.dot(pad_ref[dy:dy + H, :], w_ref[base + dy],
                           preferred_element_type=jnp.float32)
        return acc

    # ---- conv1 -> BN1 (folded) -> ReLU ----
    pad_ref[1:H + 1, :] = x.astype(jnp.bfloat16)
    out1 = jnp.maximum(conv3x3(0) * sb_ref[0] + sb_ref[1], 0.0)

    # ---- conv2 -> BN2 (folded) -> residual add -> ReLU ----
    pad_ref[1:H + 1, :] = out1.astype(jnp.bfloat16)
    out2 = conv3x3(3) * sb_ref[2] + sb_ref[3] + x
    o_ref[...] = jnp.maximum(out2, 0.0).astype(o_ref.dtype)


def _banded_conv_weights(w_oihw, W):
    """PyTorch OIHW 3x3 conv weights -> (3, W*Cin, W*Cout) block-banded bf16.

    A[dy][w_in*C + ci, w_out*C + co] = weight[co, ci, dy, dx] where
    w_in = w_out + dx - 1 (zero outside the band => W-boundary zero padding).
    """
    c_out, c_in, kh, kw = w_oihw.shape
    assert (kh, kw) == (3, 3) and c_in == c_out
    wt = jnp.transpose(w_oihw, (2, 3, 1, 0)).astype(jnp.float32)      # (3,3,Ci,Co)
    band = jnp.stack([jnp.eye(W, k=1 - dx, dtype=jnp.float32)         # (3,W,W)
                      for dx in range(3)])
    a = jnp.einsum('ydio,dab->yaibo', wt, band)                       # (3,W,Ci,W,Co)
    return a.reshape(3, W * c_in, W * c_out).astype(jnp.bfloat16)


def basic_block_pallas(x_nchw, w1_oihw, s1, b1, w2_oihw, s2, b2):
    """BasicBlock forward (stride=1, downsample=None, act=ReLU, eval-mode BN).

    x_nchw: (N, C, H, W) float32.  Returns (N, C, H, W) float32.
    """
    N, C, H, W = x_nchw.shape
    assert w1_oihw.shape == (C, C, 3, 3) and w2_oihw.shape == (C, C, 3, 3)
    WC = W * C

    # NCHW -> lane-dense (N, H, W*C); boundary transpose only, no padding copy.
    x_rows = jnp.transpose(x_nchw, (0, 2, 3, 1)).reshape(N, H, WC)

    # Both convs' block-banded weights as one (6, WC, WC) bf16 input stream.
    w_all = jnp.concatenate([_banded_conv_weights(w1_oihw, W),
                             _banded_conv_weights(w2_oihw, W)], axis=0)

    # Folded BN scale/bias, lane-tiled, packed as a single (4, W*C) stream.
    sb = jnp.stack([jnp.tile(s1.astype(jnp.float32), W),
                    jnp.tile(b1.astype(jnp.float32), W),
                    jnp.tile(s2.astype(jnp.float32), W),
                    jnp.tile(b2.astype(jnp.float32), W)], axis=0)

    out_rows = pl.pallas_call(
        _basic_block_kernel,
        out_shape=jax.ShapeDtypeStruct((N, H, WC), x_nchw.dtype),
        grid_spec=pltpu.PrefetchScalarGridSpec(
            num_scalar_prefetch=0,
            grid=(N,),                       # >=2 steps -> pipeline can overlap
            in_specs=[
                pl.BlockSpec((None, H, WC), lambda n: (n, 0, 0)),
                pl.BlockSpec((6, WC, WC), lambda n: (0, 0, 0)),
                pl.BlockSpec((4, WC), lambda n: (0, 0)),
            ],
            out_specs=pl.BlockSpec((None, H, WC), lambda n: (n, 0, 0)),
            scratch_shapes=[pltpu.VMEM((H + 2, WC), jnp.bfloat16)],
        ),
        compiler_params=pltpu.CompilerParams(
            dimension_semantics=("parallel",)),
        # note: raise vmem_limit_bytes / add an H-tiled axis when scaling to
        # real ResNet shapes (especially on v7x with 64 MiB VMEM).
    )(x_rows, w_all, sb)

    return jnp.transpose(out_rows.reshape(N, H, W, C), (0, 3, 1, 2))   # NCHW


def _reference_forward(x, w1, s1, b1, w2, s2, b2):
    """Pure-JAX f32 reference (NCHW, matches PyTorch eval-mode semantics)."""
    dn = jax.lax.conv_dimension_numbers(x.shape, w1.shape,
                                        ("NCHW", "OIHW", "NCHW"))
    out = jax.lax.conv_general_dilated(x, w1, (1, 1), ((1, 1), (1, 1)),
                                       dimension_numbers=dn)
    out = out * s1[None, :, None, None] + b1[None, :, None, None]
    out = jnp.maximum(out, 0.0)
    out = jax.lax.conv_general_dilated(out, w2, (1, 1), ((1, 1), (1, 1)),
                                       dimension_numbers=dn)
    out = out * s2[None, :, None, None] + b2[None, :, None, None]
    out = out + x
    return jnp.maximum(out, 0.0)


if __name__ == "__main__":
    # Small shapes consistent with BasicBlock(inplanes=8, planes=8, stride=1).
    # C=8, W=16 makes the lane-dense row width W*C = 128.
    N, C, H, W = 2, 8, 16, 16

    key = jax.random.PRNGKey(0)
    k1, k2, k3, k4, k5, k6, kx = jax.random.split(key, 7)

    # conv3x3 weights (bias=False, PyTorch OIHW layout).
    w1 = jax.random.normal(k1, (C, C, 3, 3), jnp.float32) * 0.1
    w2 = jax.random.normal(k2, (C, C, 3, 3), jnp.float32) * 0.1

    # BatchNorm2d params (synthetic, deterministic), folded to scale/shift.
    eps = 1e-5
    gamma1 = 1.0 + 0.1 * jax.random.normal(k3, (C,), jnp.float32)
    beta1 = 0.1 * jax.random.normal(k4, (C,), jnp.float32)
    mean1 = 0.05 * jax.random.normal(k5, (C,), jnp.float32)
    var1 = 1.0 + 0.1 * jax.random.uniform(k6, (C,), jnp.float32)
    s1 = gamma1 / jnp.sqrt(var1 + eps)
    b1 = beta1 - mean1 * s1

    gamma2 = 1.0 + 0.1 * jax.random.normal(k4, (C,), jnp.float32)
    beta2 = 0.1 * jax.random.normal(k5, (C,), jnp.float32)
    mean2 = 0.05 * jax.random.normal(k6, (C,), jnp.float32)
    var2 = 1.0 + 0.1 * jax.random.uniform(k3, (C,), jnp.float32)
    s2 = gamma2 / jnp.sqrt(var2 + eps)
    b2 = beta2 - mean2 * s2

    x = jax.random.normal(kx, (N, C, H, W), jnp.float32)

    out = basic_block_pallas(x, w1, s1, b1, w2, s2, b2)
    out = jax.block_until_ready(out)

    ref = _reference_forward(x, w1, s1, b1, w2, s2, b2)
    assert out.shape == (N, C, H, W)
    # Tolerance accounts for bf16 MXU operands (f32 accumulation) vs f32 ref.
    max_err = float(jnp.max(jnp.abs(out - ref)))
    assert jnp.allclose(out, ref, atol=5e-2, rtol=5e-2), max_err

    print("KERNEL_OK")
</pallas_src>

<mosaic_0001>
module attributes {stable_mosaic.version = 11 : i64} {
  func.func @_basic_block_kernel(%arg0: i32, %arg1: memref<1x16x128xf32, #tpu.memory_space<vmem>>, %arg2: memref<6x128x128xbf16, #tpu.memory_space<vmem>>, %arg3: memref<4x128xf32, #tpu.memory_space<vmem>>, %arg4: memref<1x16x128xf32, #tpu.memory_space<vmem>>, %arg5: memref<18x128xbf16, #tpu.memory_space<vmem>>) attributes {dimension_semantics = [#tpu.dimension_semantics<parallel>], iteration_bounds = array<i64: 2>, scalar_prefetch = 0 : i64, scratch_operands = 1 : i64, tpu.core_type = #tpu.core_type<tc>, window_params = [{transform_indices = @transform_0, window_bounds = array<i64: 1, 16, 128>}, {pipeline_mode = #tpu.pipeline_mode<synchronous>, transform_indices = @transform_1, window_bounds = array<i64: 6, 128, 128>}, {pipeline_mode = #tpu.pipeline_mode<synchronous>, transform_indices = @transform_2, window_bounds = array<i64: 4, 128>}, {transform_indices = @transform_3, window_bounds = array<i64: 1, 16, 128>}]} {
    %cst = arith.constant 0.000000e+00 : bf16
    %0 = vector.broadcast %cst : bf16 to vector<1x128xbf16>
    %c0 = arith.constant 0 : index
    %c0_0 = arith.constant 0 : index
    %1 = vector.load %arg5[%c0, %c0_0] : memref<18x128xbf16, #tpu.memory_space<vmem>>, vector<1x128xbf16>
    tpu.vector_store %arg5[%c0, %c0_0], %0 {strides = array<i32>} : memref<18x128xbf16, #tpu.memory_space<vmem>>, vector<1x128xbf16>,
    %c17 = arith.constant 17 : index
    %c0_1 = arith.constant 0 : index
    %2 = vector.load %arg5[%c17, %c0_1] : memref<18x128xbf16, #tpu.memory_space<vmem>>, vector<1x128xbf16>
    tpu.vector_store %arg5[%c17, %c0_1], %0 {strides = array<i32>} : memref<18x128xbf16, #tpu.memory_space<vmem>>, vector<1x128xbf16>,
    %c0_2 = arith.constant 0 : index
    %c0_3 = arith.constant 0 : index
    %c0_4 = arith.constant 0 : index
    %3 = vector.load %arg1[%c0_2, %c0_3, %c0_4] : memref<1x16x128xf32, #tpu.memory_space<vmem>>, vector<1x16x128xf32>
    %4 = vector.shape_cast %3 : vector<1x16x128xf32> to vector<16x128xf32>
    %5 = arith.truncf %4 : vector<16x128xf32> to vector<16x128xbf16>
    %c1 = arith.constant 1 : index
    %c0_5 = arith.constant 0 : index
    %6 = vector.load %arg5[%c1, %c0_5] : memref<18x128xbf16, #tpu.memory_space<vmem>>, vector<16x128xbf16>
    tpu.vector_store %arg5[%c1, %c0_5], %5 {strides = array<i32>} : memref<18x128xbf16, #tpu.memory_space<vmem>>, vector<16x128xbf16>,
    %cst_6 = arith.constant 0.000000e+00 : f32
    %7 = vector.broadcast %cst_6 : f32 to vector<16x128xf32>
    %c0_7 = arith.constant 0 : index
    %c0_8 = arith.constant 0 : index
    %8 = vector.load %arg5[%c0_7, %c0_8] : memref<18x128xbf16, #tpu.memory_space<vmem>>, vector<16x128xbf16>
    %c0_9 = arith.constant 0 : index
    %c0_10 = arith.constant 0 : index
    %c0_11 = arith.constant 0 : index
    %9 = vector.load %arg2[%c0_9, %c0_10, %c0_11] : memref<6x128x128xbf16, #tpu.memory_space<vmem>>, vector<1x128x128xbf16>
    %10 = vector.shape_cast %9 : vector<1x128x128xbf16> to vector<128x128xbf16>
    %cst_12 = arith.constant dense<0.000000e+00> : vector<16x128xf32>
    %11 = tpu.matmul %8, %10, %cst_12 {dimension_numbers = #tpu.dot_dimension_numbers<[1], [0], [0], [1], [0, 0, 1, 1], [], []>} : vector<16x128xbf16>, vector<128x128xbf16>, vector<16x128xf32> -> vector<16x128xf32>
    %12 = arith.addf %7, %11 : vector<16x128xf32>
    %c1_13 = arith.constant 1 : index
    %c0_14 = arith.constant 0 : index
    %13 = vector.load %arg5[%c1_13, %c0_14] : memref<18x128xbf16, #tpu.memory_space<vmem>>, vector<16x128xbf16>
    %c1_15 = arith.constant 1 : index
    %c0_16 = arith.constant 0 : index
    %c0_17 = arith.constant 0 : index
    %14 = vector.load %arg2[%c1_15, %c0_16, %c0_17] : memref<6x128x128xbf16, #tpu.memory_space<vmem>>, vector<1x128x128xbf16>
    %15 = vector.shape_cast %14 : vector<1x128x128xbf16> to vector<128x128xbf16>
    %cst_18 = arith.constant dense<0.000000e+00> : vector<16x128xf32>
    %16 = tpu.matmul %13, %15, %cst_18 {dimension_numbers = #tpu.dot_dimension_numbers<[1], [0], [0], [1], [0, 0, 1, 1], [], []>} : vector<16x128xbf16>, vector<128x128xbf16>, vector<16x128xf32> -> vector<16x128xf32>
    %17 = arith.addf %12, %16 : vector<16x128xf32>
    %c2 = arith.constant 2 : index
    %c0_19 = arith.constant 0 : index
    %18 = vector.load %arg5[%c2, %c0_19] : memref<18x128xbf16, #tpu.memory_space<vmem>>, vector<16x128xbf16>
    %c2_20 = arith.constant 2 : index
    %c0_21 = arith.constant 0 : index
    %c0_22 = arith.constant 0 : index
    %19 = vector.load %arg2[%c2_20, %c0_21, %c0_22] : memref<6x128x128xbf16, #tpu.memory_space<vmem>>, vector<1x128x128xbf16>
    %20 = vector.shape_cast %19 : vector<1x128x128xbf16> to vector<128x128xbf16>
    %cst_23 = arith.constant dense<0.000000e+00> : vector<16x128xf32>
    %21 = tpu.matmul %18, %20, %cst_23 {dimension_numbers = #tpu.dot_dimension_numbers<[1], [0], [0], [1], [0, 0, 1, 1], [], []>} : vector<16x128xbf16>, vector<128x128xbf16>, vector<16x128xf32> -> vector<16x128xf32>
    %22 = arith.addf %17, %21 : vector<16x128xf32>
    %c0_24 = arith.constant 0 : index
    %c0_25 = arith.constant 0 : index
    %23 = vector.load %arg3[%c0_24, %c0_25] : memref<4x128xf32, #tpu.memory_space<vmem>>, vector<1x128xf32>
    %24 = vector.shape_cast %23 : vector<1x128xf32> to vector<128xf32>
    %25 = vector.shape_cast %24 : vector<128xf32> to vector<1x128xf32>
    %26 = vector.broadcast %25 : vector<1x128xf32> to vector<16x128xf32>
    %27 = arith.mulf %22, %26 : vector<16x128xf32>
    %c1_26 = arith.constant 1 : index
    %c0_27 = arith.constant 0 : index
    %28 = vector.load %arg3[%c1_26, %c0_27] : memref<4x128xf32, #tpu.memory_space<vmem>>, vector<1x128xf32>
    %29 = vector.shape_cast %28 : vector<1x128xf32> to vector<128xf32>
    %30 = vector.shape_cast %29 : vector<128xf32> to vector<1x128xf32>
    %31 = vector.broadcast %30 : vector<1x128xf32> to vector<16x128xf32>
    %32 = arith.addf %27, %31 : vector<16x128xf32>
    %cst_28 = arith.constant 0.000000e+00 : f32
    %33 = vector.broadcast %cst_28 : f32 to vector<16x128xf32>
    %34 = arith.maximumf %32, %33 : vector<16x128xf32>
    %35 = arith.truncf %34 : vector<16x128xf32> to vector<16x128xbf16>
    %c1_29 = arith.constant 1 : index
    %c0_30 = arith.constant 0 : index
    %36 = vector.load %arg5[%c1_29, %c0_30] : memref<18x128xbf16, #tpu.memory_space<vmem>>, vector<16x128xbf16>
    tpu.vector_store %arg5[%c1_29, %c0_30], %35 {strides = array<i32>} : memref<18x128xbf16, #tpu.memory_space<vmem>>, vector<16x128xbf16>,
    %cst_31 = arith.constant 0.000000e+00 : f32
    %37 = vector.broadcast %cst_31 : f32 to vector<16x128xf32>
    %c0_32 = arith.constant 0 : index
    %c0_33 = arith.constant 0 : index
    %38 = vector.load %arg5[%c0_32, %c0_33] : memref<18x128xbf16, #tpu.memory_space<vmem>>, vector<16x128xbf16>
    %c3 = arith.constant 3 : index
    %c0_34 = arith.constant 0 : index
    %c0_35 = arith.constant 0 : index
    %39 = vector.load %arg2[%c3, %c0_34, %c0_35] : memref<6x128x128xbf16, #tpu.memory_space<vmem>>, vector<1x128x128xbf16>
    %40 = vector.shape_cast %39 : vector<1x128x128xbf16> to vector<128x128xbf16>
    %cst_36 = arith.constant dense<0.000000e+00> : vector<16x128xf32>
    %41 = tpu.matmul %38, %40, %cst_36 {dimension_numbers = #tpu.dot_dimension_numbers<[1], [0], [0], [1], [0, 0, 1, 1], [], []>} : vector<16x128xbf16>, vector<128x128xbf16>, vector<16x128xf32> -> vector<16x128xf32>
    %42 = arith.addf %37, %41 : vector<16x128xf32>
    %c1_37 = arith.constant 1 : index
    %c0_38 = arith.constant 0 : index
    %43 = vector.load %arg5[%c1_37, %c0_38] : memref<18x128xbf16, #tpu.memory_space<vmem>>, vector<16x128xbf16>
    %c4 = arith.constant 4 : index
    %c0_39 = arith.constant 0 : index
    %c0_40 = arith.constant 0 : index
    %44 = vector.load %arg2[%c4, %c0_39, %c0_40] : memref<6x128x128xbf16, #tpu.memory_space<vmem>>, vector<1x128x128xbf16>
    %45 = vector.shape_cast %44 : vector<1x128x128xbf16> to vector<128x128xbf16>
    %cst_41 = arith.constant dense<0.000000e+00> : vector<16x128xf32>
    %46 = tpu.matmul %43, %45, %cst_41 {dimension_numbers = #tpu.dot_dimension_numbers<[1], [0], [0], [1], [0, 0, 1, 1], [], []>} : vector<16x128xbf16>, vector<128x128xbf16>, vector<16x128xf32> -> vector<16x128xf32>
    %47 = arith.addf %42, %46 : vector<16x128xf32>
    %c2_42 = arith.constant 2 : index
    %c0_43 = arith.constant 0 : index
    %48 = vector.load %arg5[%c2_42, %c0_43] : memref<18x128xbf16, #tpu.memory_space<vmem>>, vector<16x128xbf16>
    %c5 = arith.constant 5 : index
    %c0_44 = arith.constant 0 : index
    %c0_45 = arith.constant 0 : index
    %49 = vector.load %arg2[%c5, %c0_44, %c0_45] : memref<6x128x128xbf16, #tpu.memory_space<vmem>>, vector<1x128x128xbf16>
    %50 = vector.shape_cast %49 : vector<1x128x128xbf16> to vector<128x128xbf16>
    %cst_46 = arith.constant dense<0.000000e+00> : vector<16x128xf32>
    %51 = tpu.matmul %48, %50, %cst_46 {dimension_numbers = #tpu.dot_dimension_numbers<[1], [0], [0], [1], [0, 0, 1, 1], [], []>} : vector<16x128xbf16>, vector<128x128xbf16>, vector<16x128xf32> -> vector<16x128xf32>
    %52 = arith.addf %47, %51 : vector<16x128xf32>
    %c2_47 = arith.constant 2 : index
    %c0_48 = arith.constant 0 : index
    %53 = vector.load %arg3[%c2_47, %c0_48] : memref<4x128xf32, #tpu.memory_space<vmem>>, vector<1x128xf32>
    %54 = vector.shape_cast %53 : vector<1x128xf32> to vector<128xf32>
    %55 = vector.shape_cast %54 : vector<128xf32> to vector<1x128xf32>
    %56 = vector.broadcast %55 : vector<1x128xf32> to vector<16x128xf32>
    %57 = arith.mulf %52, %56 : vector<16x128xf32>
    %c3_49 = arith.constant 3 : index
    %c0_50 = arith.constant 0 : index
    %58 = vector.load %arg3[%c3_49, %c0_50] : memref<4x128xf32, #tpu.memory_space<vmem>>, vector<1x128xf32>
    %59 = vector.shape_cast %58 : vector<1x128xf32> to vector<128xf32>
    %60 = vector.shape_cast %59 : vector<128xf32> to vector<1x128xf32>
    %61 = vector.broadcast %60 : vector<1x128xf32> to vector<16x128xf32>
    %62 = arith.addf %57, %61 : vector<16x128xf32>
    %63 = arith.addf %62, %4 : vector<16x128xf32>
    %cst_51 = arith.constant 0.000000e+00 : f32
    %64 = vector.broadcast %cst_51 : f32 to vector<16x128xf32>
    %65 = arith.maximumf %63, %64 : vector<16x128xf32>
    %c0_52 = arith.constant 0 : index
    %c0_53 = arith.constant 0 : index
    %c0_54 = arith.constant 0 : index
    %66 = vector.load %arg4[%c0_52, %c0_53, %c0_54] : memref<1x16x128xf32, #tpu.memory_space<vmem>>, vector<1x16x128xf32>
    %67 = vector.shape_cast %66 : vector<1x16x128xf32> to vector<16x128xf32>
    %68 = vector.shape_cast %65 : vector<16x128xf32> to vector<1x16x128xf32>
    tpu.vector_store %arg4[%c0_52, %c0_53, %c0_54], %68 {strides = array<i32>} : memref<1x16x128xf32, #tpu.memory_space<vmem>>, vector<1x16x128xf32>,
    return
  }
  func.func @transform_0(%arg0: i32) -> (i32, i32, i32) {
    %c0_i32 = arith.constant 0 : i32
    %c0_i32_0 = arith.constant 0 : i32
    %c0_i32_1 = arith.constant 0 : i32
    return %arg0, %c0_i32, %c0_i32_0 : i32, i32, i32
  }
  func.func @transform_1(%arg0: i32) -> (i32, i32, i32) {
    %c0_i32 = arith.constant 0 : i32
    %c0_i32_0 = arith.constant 0 : i32
    %c0_i32_1 = arith.constant 0 : i32
    %c0_i32_2 = arith.constant 0 : i32
    return %c0_i32, %c0_i32_0, %c0_i32_1 : i32, i32, i32
  }
  func.func @transform_2(%arg0: i32) -> (i32, i32) {
    %c0_i32 = arith.constant 0 : i32
    %c0_i32_0 = arith.constant 0 : i32
    %c0_i32_1 = arith.constant 0 : i32
    return %c0_i32, %c0_i32_0 : i32, i32
  }
  func.func @transform_3(%arg0: i32) -> (i32, i32, i32) {
    %c0_i32 = arith.constant 0 : i32
    %c0_i32_0 = arith.constant 0 : i32
    %c0_i32_1 = arith.constant 0 : i32
    return %arg0, %c0_i32, %c0_i32_0 : i32, i32, i32
  }
}

</mosaic_0001>

<bundles_post_ra>
// kernel: tpu_custom_call.1
= control target key start
LH: loop header
LB: loop body
LE: loop exit
PB: predicated region body
PF: predicated region fallthrough
CT: control target
= control target key end

     0   :  { %8 = vsyncpa [#allocation4], 0  ;;  %s2031_s0 = inlined_call_operand.hbm [shape: f32[2,16,128], index: 0, kind: input, shape index: {}]   ;;  %s2032_s1 = inlined_call_operand.hbm [shape: bf16[6,128,128], index: 1, kind: input, shape index: {}]   ;;  %s2033_s2 = inlined_call_operand.hbm [shape: f32[4,128], index: 2, kind: input, shape index: {}]   ;;  %s2034_s3 = inlined_call_operand.hbm [shape: f32[2,16,128], index: 3, kind: output, shape index: {}]  }
   0x1   :  { %10 = vsyncpa [#allocation4 + $0x1], 0 }
   0x2   :  { %11 = vsyncpa [#allocation7], 0 }
   0x3   :  { %12 = vsyncpa [#allocation5], 0 }
   0x4   :  { %14 = vsyncpa [#allocation5 + $0x1], 0  ;;  %s1719_s12 = smov 0   ;;  %s1721_s13 = smov 0  }
   0x5   :  { %s1723_s14 = smov 0   ;;  %s1725_s15 = smov 0  }
   0x6 LB: > { %s1740_s16 = sadd.s32 4294967295, %s1685_s15   ;;  %s1148_s17 = sadd.s32 4294967294, %s1685_s15   ;;  %s1685_s15 = sphi %s1725_s15, %s2064_s15   ;;  %s1681_s14 = sphi %s1723_s14, %s2063_s14   ;;  %s1677_s13 = sphi %s1721_s13, %s2062_s13   ;;  %s1673_s12 = sphi %s1719_s12, %s2061_s12  }
   0x7   : > { %p40_p0 = scmp.ne.s32.totalorder %s1677_s13, %s1673_s12  ;;  %p2035_p1 = scmp.eq.s32.totalorder %s1740_s16, 0 }
   0x8   : > { %p112_p3 = scmp.eq.s32.totalorder %s1148_s17, 1  ;;  %p1149_p5 = scmp.ge.s32.totalorder %s1685_s15, 1 }
   0x9   : > { %p1749_p4 = por %p2035_p1, %p40_p0  ;;  %p119_p7 = scmp.lt.s32.totalorder %s1685_s15, 3 }
   0xa   : > { %p1754_p6 = por %p112_p3, %p40_p0  ;;  %s1687_s21 = smov [#allocation6]  }
   0xb   : > { %s2039_s18 = scalar_select %p1749_p4, 1, 0 }
   0xc   : > { %s2040_s19 = scalar_select %p1754_p6, 1, 0 }
   0xd   : > { %p1759_p8 = pnand %p1149_p5, %p119_p7  ;;  %s131_s22 = sshll.u32 %s1687_s21, 4  ;;  %s132_s22 = int_to_ptr.vmem [resolvable:$true] %s131_s22 }
   0xe   : > { %s1688_s24 = smov [#allocation8]   ;;  %s1548_s26 = scalar_lea.vmem %s132_s22, 6144 }
   0xf   : > { %s2041_s20 = scalar_select %p1759_p8, 1, 0 }
  0x10   : > { %p1420_p9 = pneg %p1759_p8  ;;  %s145_s25 = sshll.u32 %s1688_s24, 4  ;;  %s146_s25 = int_to_ptr.vmem [resolvable:$true] %s145_s25 }
  0x11   : > { %p1549_p13 = scmp.ne.s32.totalorder %s132_s22, %s1548_s26  ;;  %p1556_p5 = scmp.lt.s32.totalorder %s132_s22, %s132_s22 }
  0x12   : > { %p1768_p11 = pnand %p1420_p9, %p2035_p1  ;;  %p1557_p7 = scmp.lt.s32.totalorder %s1548_s26, %s1548_s26 }
  0x14   : > { %p1539_p12 = pneg %p1768_p11  ;;  %p1558_p10 = por %p1557_p7, %p1556_p5 }
  0x16   : > { %p1551_p0 = pnand %p1549_p13, %p1539_p12 }
  0x18   : > { %p1552_p3 = pneg %p1551_p0 }
  0x1a   : > { %p1559_p9 = pnand %p1558_p10, %p1552_p3 }
  0x1c   : > { %1562 = shalt.err (!%p1559_p9)
}
  0x1d   : > { %s1689_s27 = smov 64   ;;  %s1690_s28 = smov 4  }
  0x1e   : > { %1423 = dma.hbm_to_vmem [thread:$0]  (!%p1768_p11), %s2032_s1, 6144, %s132_s22, [#allocation7], %s1689_s27, %s1689_s27, %s1690_s28  }
  0x1f   : > { %s1574_s4 = scalar_lea.vmem %s146_s25, 64  ;;  %p1582_p2 = scmp.lt.s32.totalorder %s146_s25, %s146_s25 }
  0x20   : > { %p1575_p1 = scmp.ne.s32.totalorder %s146_s25, %s1574_s4  ;;  %p1583_p6 = scmp.lt.s32.totalorder %s1574_s4, %s1574_s4 }
  0x22   : > { %p1577_p13 = pnand %p1575_p1, %p1539_p12  ;;  %p1584_p5 = por %p1583_p6, %p1582_p2 }
  0x24   : > { %p1578_p0 = pneg %p1577_p13 }
  0x26   : > { %p1585_p10 = pnand %p1584_p5, %p1578_p0 }
  0x28   : > { %1588 = shalt.err (!%p1585_p10)
}
  0x29   : > { %1426 = dma.hbm_to_vmem [thread:$0]  (!%p1768_p11), %s2033_s2, 64, %s146_s25, [#allocation7]  }
  0x2a   : > { %s1791_s7 = sadd.s32 1, %s1685_s15   ;;  %s27_s8 = sadd.s32 1, %s1681_s14 }
  0x2b   : > { %s24_s9 = ssub.s32 %s1685_s15, %s1791_s7  ;;  %p34_p1 = scmp.ne.s32.totalorder %s1681_s14, %s1677_s13 }
  0x2c   : > { %p25_p2 = scmp.eq.s32.totalorder %s24_s9, 0  ;;  %p35_p6 = scmp.eq.s32.totalorder %s1685_s15, 0 }
  0x2d   : > { %p2043_p12 = scmp.eq.s32.totalorder %s1740_s16, 1  ;;  %p1437_p7 = scmp.lt.s32.totalorder %s1685_s15, 2 }
  0x2e   : > { %s1807_s11 = scalar_select %p25_p2, %s1681_s14, %s27_s8  }
  0x2f   : > { %p1801_p3 = por %p2043_p12, %p34_p1  ;;  %p36_p9 = por %p35_p6, %p34_p1 }
  0x30   : > { %s156_s17 = sand.u32 1, %s1681_s14   ;;  %s1228_s22 = sshll.u32 %s1685_s15, 8 }
  0x31   : > { %s2044_s10 = scalar_select %p1801_p3, 1, 0 }
  0x32   : > { %s1153_s21 = sshll.u32 %s156_s17, 4  ;;  %s1814_s25 = scalar_lea.hbm %s2031_s0, %s1228_s22 }
  0x33   : > { %s160_s26 = scalar_lea.vmem [#allocation3], %s1153_s21  ;;  %p1818_p11 = pnand %p1437_p7, %p36_p9 }
  0x34   : > { %s167_s27 = sshll.u32 %s160_s26, 4  ;;  %s1822_s29 = scalar_lea.sflag [#allocation4], %s156_s17  ;;  %s1816_s27 = int_to_ptr.vmem [resolvable:$true] %s167_s27 }
  0x35   : > { %s1589_s30 = scalar_lea.hbm %s1814_s25, 256  ;;  %p1591_p0 = pneg %p1818_p11 }
  0x36   : > { %p1590_p13 = scmp.ne.s32.totalorder %s1814_s25, %s1589_s30  ;;  %s1594_s6 = scalar_lea.hbm %s2031_s0, 512 }
  0x37   : > { %p1595_p1 = scmp.lt.s32.totalorder %s1814_s25, %s2031_s0  ;;  %p1596_p2 = scmp.lt.s32.totalorder %s1594_s6, %s1589_s30 }
  0x38   : > { %p1592_p5 = pnand %p1591_p0, %p1590_p13 }
  0x39   : > { %p1597_p6 = por %p1596_p2, %p1595_p1 }
  0x3a   : > { %p1593_p10 = pneg %p1592_p5 }
  0x3c   : > { %p1598_p12 = pnand %p1597_p6, %p1593_p10 }
  0x3e   : > { %1601 = shalt.err (!%p1598_p12)
}
  0x3f   : > { %s1602_s17 = scalar_lea.vmem %s1816_s27, 256  ;;  %s1691_s21 = smov [#allocation3]  }
  0x40   : > { %p1603_p7 = scmp.ne.s32.totalorder %s1816_s27, %s1602_s17  ;;  %s1607_s22 = sshll.u32 %s1691_s21, 4  ;;  %s1608_s22 = int_to_ptr.vmem [resolvable:$false] %s1607_s22 }
  0x41   : > { %s1609_s23 = scalar_lea.vmem %s1608_s22, 512  ;;  %p1610_p5 = scmp.lt.s32.totalorder %s1816_s27, %s1608_s22 }
  0x42   : > { %p1605_p9 = pnand %p1603_p7, %p1591_p0  ;;  %p1611_p3 = scmp.lt.s32.totalorder %s1609_s23, %s1602_s17 }
  0x44   : > { %p1606_p13 = pneg %p1605_p9  ;;  %p1612_p4 = por %p1611_p3, %p1610_p5 }
  0x46   : > { %p1613_p8 = pnand %p1612_p4, %p1606_p13 }
  0x48   : > { %1616 = shalt.err (!%p1613_p8)
}
  0x49   : > { %s1692_s24 = smov 128   ;;  %s1693_s26 = smov 8  }
  0x4a   : > { %1430 = dma.hbm_to_vmem [thread:$0]  (!%p1818_p11), %s1814_s25, 256, %s1816_s27, %s1822_s29, %s1692_s24, %s1692_s24, %s1693_s26  }
  0x4b   : > { %p2046_p0 = scmp.ne.s32.totalorder %s2041_s20, 0 }
  0x4c   : > { %s1846_s30 = sand.u32 (!%p2046_p0), 1, %s1677_s13   ;;  %p2047_p4 = scmp.ne.s32.totalorder (!%p2046_p0), %s2039_s18, 0 }
  0x4d   : > { %179 = sbr.rel (%p2046_p0) target bundleno = 636 (0x27c), region = 32  ;;  %s1157_s4 = sshll.u32 (!%p2046_p0), %s1846_s30, 4 }
  0x4e   : > { %s182_s5 = scalar_lea.sflag (!%p2046_p0), [#allocation4], %s1846_s30  ;;  %s1852_s6 = scalar_lea.vmem (!%p2046_p0), [#allocation3], %s1157_s4 }
  0x52   : > { %1660 = dma.done.wait (%p2047_p4), %s182_s5, 256  }
  0x53   : > { %1662 = vsyncadd (%p2047_p4), %s182_s5, 4294967040  ;;  %p2048_p8 = scmp.eq.s32.totalorder %s1740_s16, 0 }
  0x55   : > { %1664 = dma.done.wait (%p2048_p8), [#allocation7], 6208   ;;  %p2049_p3 = pmov %p2048_p8 }
  0x56   : > { %v1694_v0 = vmov 0.0   ;;  %vm1695_vm0 = vmmov 0   ;;  %v1483_v1 = vld [vmem:[#allocation6 + $0x78] sm:$0xff]   ;;  %v1485_v3 = vld [vmem:[#allocation6 + $0x70] sm:$0xff]   ;;  %v1487_v5 = vld [vmem:[#allocation6 + $0x68] sm:$0xff]   ;;  %vm217_vm1 = vcmask 1040384  }
  0x57   : > { %1666 = vsyncadd (%p2049_p3), [#allocation7], 4294961088  ;;  %1288 = vmatprep.subr.bf16.mxu0 %v1694_v0  ;;  %1308 = vmatprep.subr.bf16.mxu1 %v1694_v0  ;;  %v1484_v2 = vld [vmem:[#allocation6 + $0x38] sm:$0xff]   ;;  %v1486_v4 = vld [vmem:[#allocation6 + $0x30] sm:$0xff]   ;;  %vm218_vm2 = vsmask.f32 256 }
  0x58   : > { %1304 = vmatprep.mubr.msk.bf16.mxu0 %vm1695_vm0, %v1694_v0  ;;  %1324 = vmatprep.mubr.msk.bf16.mxu1 %vm1695_vm0, %v1694_v0  ;;  %v1488_v6 = vld [vmem:[#allocation6 + $0x28] sm:$0xff]   ;;  %vm223_vm3 = vsmask.f32 7938  ;;  %v1489_v7 = vld [vmem:[#allocation6 + $0x60] sm:$0xff]   ;;  %vm1875_vm4 = vmand %vm217_vm1, %vm218_vm2  ;;  %vm236_vm6 = vsmask.f32 4368 }
  0x59   : > { %1289 = vmatpush3.bf16.msra.mxu0 %v1483_v1  ;;  %1309 = vmatpush3.bf16.msra.mxu1 %v1484_v2  ;;  %v1490_v8 = vld [vmem:[#allocation6 + $0x20] sm:$0xff]   ;;  %vm1880_vm5 = vmand %vm217_vm1, %vm223_vm3  ;;  %v1491_v11 = vld [vmem:[#allocation6 + $0x58] sm:$0xff]   ;;  %vm258_vm7 = vcmask 1043456   ;;  %vm311_vm10 = vsmask.f32 7424  ;;  %vm525_vm11 = vcmask 1046528  }
  0x5a   : > { %1290 = vmatprep.subr.bf16.mxu0 %v1694_v0  ;;  %1310 = vmatprep.subr.bf16.mxu1 %v1694_v0  ;;  %v1492_v12 = vld [vmem:[#allocation6 + $0x18] sm:$0xff]   ;;  %v220_v13 = vld [vmem:[#allocation2] sm:$0x1]  ;;  %vm1904_vm8 = vmor %vm218_vm2, %vm236_vm6  ;;  %s1233_s18 = sshll.u32 %s1740_s16, 8  ;;  %s215_s20 = scalar_lea.vmem [#allocation9], %s1157_s4 }
  0x5b   : > { %v225_v14 = vld [vmem:[#allocation2 + $0x8] sm:$0x1]  ;;  %v1887_v15 = vld [vmem:[%s1852_s6] sm:$0xff]  ;;  %v221_v17 = vsel %vm1875_vm4, 0, %v220_v13  ;;  %vm1910_vm9 = vmand %vm258_vm7, %vm223_vm3  ;;  %s1056_s25 = sshll.u32 %s215_s20, 4  ;;  %s1986_s29 = scalar_lea.hbm %s2034_s3, %s1233_s18  ;;  %s1988_s25 = int_to_ptr.vmem [resolvable:$true] %s1056_s25 }
  0x5c   : > { %v1493_v16 = vld [vmem:[#allocation6 + $0x50] sm:$0xff]   ;;  %v226_v18 = vsel %vm1880_vm5, 0, %v225_v14  ;;  %v1894_v19 = vld [vmem:[%s1852_s6 + $0x8] sm:$0xff]  ;;  %v1229_v20 = vpack.c.bf16 %v1887_v15, %v1887_v15  ;;  %222 = vst [vmem:[#allocation2] sm:$0x1] %v221_v17  ;;  %v1497_v35 = vld [vmem:[#allocation6 + $0x40] sm:$0xff]  }
  0x5d   : > { %1291 = vmatpush3.bf16.msra.mxu0 %v1485_v3  ;;  %1311 = vmatpush3.bf16.msra.mxu1 %v1486_v4  ;;  %227 = vst [vmem:[#allocation2 + $0x8] sm:$0x1] %v226_v18  ;;  %v1230_v21 = vpack.c.bf16 %v1894_v19, %v1894_v19  ;;  %v1494_v22 = vld [vmem:[#allocation6 + $0x10] sm:$0xff]   ;;  %v1495_v30 = vld [vmem:[#allocation6 + $0x48] sm:$0xff]   ;;  %v1498_v40 = vld [vmem:[#allocation6] sm:$0xff]   ;;  %s1043_s8 = scalar_lea.sflag [#allocation5], %s1846_s30 }
  0x5e   : > { %1292 = vmatprep.subr.bf16.mxu0 %v1694_v0  ;;  %1312 = vmatprep.subr.bf16.mxu1 %v1694_v0  ;;  %v239_v23 = vshrl.u32 %v1229_v20, 16  ;;  %v242_v24 = vshll.u32 %v1229_v20, 16  ;;  %v1496_v32 = vld [vmem:[#allocation6 + $0x8] sm:$0xff]   ;;  %v1501_v53 = vld [vmem:[#allocation6 + $0xb8] sm:$0xff]   ;;  %v1502_v56 = vld [vmem:[#allocation6 + $0xb0] sm:$0xff]   ;;  %s1617_s16 = scalar_lea.vmem %s1988_s25, 256 }
  0x5f   : > { %v247_v26 = vshrl.u32 %v1230_v21, 16  ;;  %v250_v27 = vshll.u32 %v1230_v21, 16  ;;  %v1503_v57 = vld [vmem:[#allocation6 + $0xa8] sm:$0xff]   ;;  %v1504_v58 = vld [vmem:[#allocation6 + $0xa0] sm:$0xff]   ;;  %v1505_v59 = vld [vmem:[#allocation6 + $0x98] sm:$0xff]   ;;  %p1618_p11 = scmp.ne.s32.totalorder %s1988_s25, %s1617_s16  ;;  %p2058_p10 = scmp.ne.s32.totalorder %s2044_s10, 0 }
  0x60   : > { %v241_v28 = vrot.slane %v239_v23, 7  ;;  %v1506_v60 = vld [vmem:[#allocation6 + $0x90] sm:$0xff]   ;;  %v1507_v62 = vld [vmem:[#allocation6 + $0x88] sm:$0xff]   ;;  %v1508_v1 = vld [vmem:[#allocation6 + $0x80] sm:$0xff]   ;;  %s1696_s9 = smov [#allocation9]  }
  0x61   : > { %1293 = vmatpush3.bf16.msra.mxu0 %v1487_v5  ;;  %1313 = vmatpush3.bf16.msra.mxu1 %v1488_v6  ;;  %v249_v31 = vrot.slane %v247_v26, 7  ;;  %v1510_v5 = vld [vmem:[#allocation6 + $0xf8] sm:$0xff]   ;;  %v1511_v6 = vld [vmem:[#allocation6 + $0xf0] sm:$0xff]   ;;  %v1518_v14 = vld [vmem:[#allocation6 + $0x120] sm:$0xff]   ;;  %p1619_p1 = pnand %p1618_p11, %p2058_p10  ;;  %s1621_s17 = sshll.u32 %s1696_s9, 4  ;;  %s1622_s17 = int_to_ptr.vmem [resolvable:$false] %s1621_s17 }
  0x62   : > { %1294 = vmatprep.subr.bf16.mxu0 %v1694_v0  ;;  %1314 = vmatprep.subr.bf16.mxu1 %v1694_v0  ;;  %v244_v33 = vor.u32 %v242_v24, %v241_v28  ;;  %v245_v34 = vrot.slane %v241_v28, 4  ;;  %v1514_v10 = vld [vmem:[#allocation6 + $0x130] sm:$0xff]   ;;  %v1517_v13 = vld [vmem:[#allocation6 + $0xd8] sm:$0xff]   ;;  %v1521_v18 = vld [vmem:[#allocation6 + $0xc8] sm:$0xff]   ;;  %s1623_s21 = scalar_lea.vmem %s1622_s17, 512  ;;  %p1624_p6 = scmp.lt.s32.totalorder %s1988_s25, %s1622_s17 }
  0x63   : > { %v252_v36 = vor.u32 %v250_v27, %v249_v31  ;;  %v254_v37 = vrot.slane %v249_v31, 4  ;;  %v260_v38 = vld [vmem:[#allocation2] sm:$0xf]  ;;  %v1520_v17 = vld [vmem:[#allocation6 + $0x118] sm:$0xff]   ;;  %v1523_v21 = vld [vmem:[#allocation6 + $0xc0] sm:$0xff]   ;;  %p1620_p2 = pneg %p1619_p1  ;;  %p1625_p12 = scmp.lt.s32.totalorder %s1623_s21, %s1617_s16 }
  0x64   : > { %v264_v39 = vld [vmem:[#allocation2 + $0x8] sm:$0x1]  ;;  %v261_v42 = vsel %vm1910_vm9, %v244_v33, %v260_v38  ;;  %v1522_v20 = vld [vmem:[#allocation6 + $0x110] sm:$0xff]   ;;  %v1526_v23 = vld [vmem:[#allocation6 + $0x100] sm:$0xff]  }
  0x65   : > { %1295 = vmatpush3.bf16.msra.mxu0 %v1489_v7  ;;  %1315 = vmatpush3.bf16.msra.mxu1 %v1490_v8  ;;  %v253_v41 = vsel %vm1904_vm8, %v245_v34, %v252_v36  ;;  %v265_v43 = vsel %vm1875_vm4, %v254_v37, %v264_v39  ;;  %262 = vst [vmem:[#allocation2] sm:$0xf] %v261_v42  ;;  %v1512_v7 = vld [vmem:[#allocation6 + $0x138] sm:$0xff]   ;;  %v1513_v8 = vld [vmem:[#allocation6 + $0xe8] sm:$0xff]   ;;  %v1190_v36 = vld [vmem:[#allocation8] ss:$0 sm:$0xff]  ;;  %p1626_p7 = por %p1625_p12, %p1624_p6 }
  0x66   : > { %1296 = vmatprep.subr.bf16.mxu0 %v1694_v0  ;;  %1316 = vmatprep.subr.bf16.mxu1 %v1694_v0  ;;  %263 = vst [vmem:[#allocation2 + $0x4] sm:$0xf] %v253_v41  ;;  %266 = vst [vmem:[#allocation2 + $0x8] sm:$0x1] %v265_v43  ;;  %v1191_v38 = vld [vmem:[#allocation8 + $0x1] ss:$0 sm:$0xff] }
  0x67   : > { %v1529_v9 = vld [vmem:[#allocation6 + $0x170] sm:$0xff]   ;;  %p1627_p9 = pnand %p1626_p7, %p1620_p2 }
  0x69   : > { %1297 = vmatpush3.bf16.msra.mxu0 %v1491_v11  ;;  %1317 = vmatpush3.bf16.msra.mxu1 %v1492_v12  ;;  %v1515_v11 = vld [vmem:[#allocation6 + $0xe0] sm:$0xff]   ;;  %v1516_v12 = vld [vmem:[#allocation6 + $0x128] sm:$0xff]  }
  0x6a   : > { %1298 = vmatprep.subr.bf16.mxu0 %v1694_v0  ;;  %1318 = vmatprep.subr.bf16.mxu1 %v1694_v0 }
  0x6c   : > { %v1926_v44 = vld [vmem:[#allocation2] sm:$0xf] }
  0x6d   : > { %1299 = vmatpush3.bf16.msra.mxu0 %v1493_v16  ;;  %1319 = vmatpush3.bf16.msra.mxu1 %v1494_v22  ;;  %v268_v45 = vld [vmem:[#allocation2 + $0x4] sm:$0xf]  ;;  %v1500_v47 = vld [vmem:[#allocation2 + $0x8] ss:$0 sps:$4 sm:$0x11]   ;;  %v1519_v16 = vld [vmem:[#allocation6 + $0xd0] sm:$0xff]  }
  0x6e   : > { %1300 = vmatprep.subr.bf16.mxu0 %v1694_v0  ;;  %1320 = vmatprep.subr.bf16.mxu1 %v1694_v0  ;;  %v1163_v46 = vcombine.low %v1926_v44, %v268_v45  ;;  %v320_v50 = vshll.u32 %v1500_v47, 16  ;;  %v504_v61 = vld [vmem:[#allocation2] sm:$0xe]  ;;  %v527_v3 = vrot.slane %v1500_v47, 1  ;;  %v1524_v22 = vld [vmem:[#allocation6 + $0x108] sm:$0xff]  }
  0x6f   : > { %v1181_v63 = vcombine.low %v504_v61, %v268_v45  ;;  %v666_v61 = vld [vmem:[#allocation2 + $0x8] sm:$0x1] }
  0x70   : > { %v313_v48 = vshrl.u32 %v1163_v46, 16  ;;  %v315_v49 = vshll.u32 %v1163_v46, 16  ;;  %v322_v52 = vrot.slane %v320_v50, 1 }
  0x71   : > { %1301 = vmatpush3.bf16.msra.mxu0 %v1495_v30  ;;  %1321 = vmatpush3.bf16.msra.mxu1 %v1496_v32  ;;  %v526_v2 = vrot.slane %v1181_v63, 1 }
  0x72   : > { %1302 = vmatprep.subr.bf16.mxu0 %v1694_v0  ;;  %1322 = vmatprep.subr.bf16.mxu1 %v1694_v0  ;;  %v317_v51 = vrot.slane %v315_v49, 1 }
  0x73   : > { %v528_v4 = vsel %vm525_vm11, %v526_v2, %v527_v3 }
  0x74   : > { %v318_v54 = vor.u32 %v317_v51, %v313_v48 }
  0x75   : > { %1303 = vmatpush3.bf16.msra.mxu0 %v1497_v35  ;;  %1323 = vmatpush3.bf16.msra.mxu1 %v1498_v40 }
  0x76   : > { %1328 = vmatprep.subr.bf16.mxu0 %v1694_v0  ;;  %1348 = vmatprep.subr.bf16.mxu1 %v1694_v0  ;;  %v323_v55 = vsel %vm311_vm10, %v318_v54, %v322_v52 }
  0x78   : > { %1325 = vmatmul.mubr.bf16.vlgmr.msra.gmra.mxu1 %v1163_v46  ;;  %1305 = vmatmul.mubr.bf16.vlgmr.msra.gmra.mxu0 %v323_v55 }
  0x79   : > { %1364 = vmatprep.mubr.msk.bf16.mxu1 %vm1695_vm0, %v1694_v0  ;;  %1329 = vmatpush3.bf16.msra.mxu0 %v1501_v53 }
  0x7a   : > { %1344 = vmatprep.mubr.msk.bf16.mxu0 %vm1695_vm0, %v1694_v0  ;;  %1330 = vmatprep.subr.bf16.mxu0 %v1694_v0 }
  0x7b   : > { %1349 = vmatpush3.bf16.msra.mxu1 %v1512_v7 }
  0x7c   : > { %1350 = vmatprep.subr.bf16.mxu1 %v1694_v0 }
  0x7d   : > { %1331 = vmatpush3.bf16.msra.mxu0 %v1502_v56 }
  0x7e   : > { %1332 = vmatprep.subr.bf16.mxu0 %v1694_v0 }
  0x7f   : > { %1351 = vmatpush3.bf16.msra.mxu1 %v1514_v10 }
  0x80   : > { %1352 = vmatprep.subr.bf16.mxu1 %v1694_v0 }
  0x81   : > { %1333 = vmatpush3.bf16.msra.mxu0 %v1503_v57 }
  0x82   : > { %1334 = vmatprep.subr.bf16.mxu0 %v1694_v0 }
  0x83   : > { %1353 = vmatpush3.bf16.msra.mxu1 %v1516_v12 }
  0x84   : > { %1354 = vmatprep.subr.bf16.mxu1 %v1694_v0 }
  0x85   : > { %1335 = vmatpush3.bf16.msra.mxu0 %v1504_v58 }
  0x86   : > { %1336 = vmatprep.subr.bf16.mxu0 %v1694_v0 }
  0x87   : > { %1355 = vmatpush3.bf16.msra.mxu1 %v1518_v14  ;;  %v1530_v14 = vld [vmem:[#allocation6 + $0x168] sm:$0xff]  }
  0x88   : > { %1356 = vmatprep.subr.bf16.mxu1 %v1694_v0 }
  0x89   : > { %1337 = vmatpush3.bf16.msra.mxu0 %v1505_v59 }
  0x8a   : > { %1338 = vmatprep.subr.bf16.mxu0 %v1694_v0 }
  0x8b   : > { %1357 = vmatpush3.bf16.msra.mxu1 %v1520_v17  ;;  %v1532_v17 = vld [vmem:[#allocation6 + $0x158] sm:$0xff]  }
  0x8c   : > { %1358 = vmatprep.subr.bf16.mxu1 %v1694_v0 }
  0x8d   : > { %1339 = vmatpush3.bf16.msra.mxu0 %v1506_v60 }
  0x8e   : > { %1340 = vmatprep.subr.bf16.mxu0 %v1694_v0 }
  0x8f   : > { %1359 = vmatpush3.bf16.msra.mxu1 %v1522_v20  ;;  %v1534_v20 = vld [vmem:[#allocation6 + $0x148] sm:$0xff]  }
  0x90   : > { %1360 = vmatprep.subr.bf16.mxu1 %v1694_v0 }
  0x91   : > { %1341 = vmatpush3.bf16.msra.mxu0 %v1507_v62 }
  0x92   : > { %1342 = vmatprep.subr.bf16.mxu0 %v1694_v0 }
  0x93   : > { %1361 = vmatpush3.bf16.msra.mxu1 %v1524_v22 }
  0x94   : > { %1362 = vmatprep.subr.bf16.mxu1 %v1694_v0 }
  0x95   : > { %1343 = vmatpush3.bf16.msra.mxu0 %v1508_v1 }
  0x96   : > { %1368 = vmatprep.subr.bf16.mxu0 %v1694_v0 }
  0x97   : > { %1363 = vmatpush3.bf16.msra.mxu1 %v1526_v23  ;;  %v1535_v23 = vld [vmem:[#allocation6 + $0x140] sm:$0xff]  }
  0x98   : > { %1345 = vmatmul.mubr.bf16.vlgmr.msra.gmra.mxu0 %v528_v4  ;;  %1388 = vmatprep.subr.bf16.mxu1 %v1694_v0 }
  0x99   : > { %1384 = vmatprep.mubr.msk.bf16.mxu0 %vm1695_vm0, %v1694_v0  ;;  %1369 = vmatpush3.bf16.msra.mxu0 %v1510_v5 }
  0x9a   : > { %1370 = vmatprep.subr.bf16.mxu0 %v1694_v0 }
  0x9d   : > { %1371 = vmatpush3.bf16.msra.mxu0 %v1511_v6 }
  0x9e   : > { %1372 = vmatprep.subr.bf16.mxu0 %v1694_v0 }
  0xa1   : > { %1373 = vmatpush3.bf16.msra.mxu0 %v1513_v8 }
  0xa2   : > { %1374 = vmatprep.subr.bf16.mxu0 %v1694_v0 }
  0xa5   : > { %1375 = vmatpush3.bf16.msra.mxu0 %v1515_v11 }
  0xa6   : > { %1376 = vmatprep.subr.bf16.mxu0 %v1694_v0 }
  0xa9   : > { %1377 = vmatpush3.bf16.msra.mxu0 %v1517_v13  ;;  %v1528_v13 = vld [vmem:[#allocation6 + $0x178] sm:$0xff]  }
  0xaa   : > { %1378 = vmatprep.subr.bf16.mxu0 %v1694_v0 }
  0xad   : > { %1379 = vmatpush3.bf16.msra.mxu0 %v1519_v16  ;;  %v1531_v16 = vld [vmem:[#allocation6 + $0x160] sm:$0xff]  }
  0xae   : > { %1380 = vmatprep.subr.bf16.mxu0 %v1694_v0 }
  0xb1   : > { %1381 = vmatpush3.bf16.msra.mxu0 %v1521_v18  ;;  %v1533_v18 = vld [vmem:[#allocation6 + $0x150] sm:$0xff]  }
  0xb2   : > { %1382 = vmatprep.subr.bf16.mxu0 %v1694_v0 }
  0xb5   : > { %1383 = vmatpush3.bf16.msra.mxu0 %v1523_v21 }
 0x138   : > { %v497_v24 = vpop.f32.mrf.mxu1  ;;  %v407_v30 = vpop.f32.mrf.mxu0 }
 0x139   : > { %v498_v34 = vadd.f32 %v497_v24, %v407_v30 }
 0x13a   : > { %v1326_v26 = vpop.f32.mrf.mxu1  ;;  %v1306_v31 = vpop.f32.mrf.mxu0 }
 0x13c   : > { %v500_v27 = vpop.f32.mrf.mxu1  ;;  %v410_v32 = vpop.f32.mrf.mxu0 }
 0x13d   : > { %v501_v40 = vadd.f32 %v500_v27, %v410_v32 }
 0x13e   : > { %v1327_v28 = vpop.f32.mrf.mxu1  ;;  %v1307_v33 = vpop.f32.mrf.mxu0 }
 0x158   : > { %v612_v35 = vpop.f32.mrf.mxu0 }
 0x159   : > { %v619_v37 = vadd.f32 %v612_v35, %v498_v34 }
 0x15a   : > { %v1346_v39 = vpop.f32.mrf.mxu0 }
 0x15b   : > { %v626_v41 = vmul.f32 %v1190_v36, %v619_v37  ;;  %v1221_v39 = vld [vmem:[#allocation8 + $0x2] ss:$0 sm:$0xff] }
 0x15c   : > { %v615_v42 = vpop.f32.mrf.mxu0 }
 0x15d   : > { %v633_v43 = vadd.f32 %v1191_v38, %v626_v41  ;;  %v620_v45 = vadd.f32 %v615_v42, %v501_v40  ;;  %v1222_v40 = vld [vmem:[#allocation8 + $0x3] ss:$0 sm:$0xff] }
 0x15e   : > { %v1347_v46 = vpop.f32.mrf.mxu0 }
 0x15f   : > { %v635_v47 = vmax.f32 %v633_v43, 0.0  ;;  %v627_v48 = vmul.f32 %v1190_v36, %v620_v45 }
 0x161   : > { %v1231_v49 = vpack.c.bf16 %v635_v47, %v635_v47  ;;  %v634_v50 = vadd.f32 %v1191_v38, %v627_v48 }
 0x163   : > { %v644_v51 = vshrl.u32 %v1231_v49, 16  ;;  %v636_v52 = vmax.f32 %v634_v50, 0.0  ;;  %v647_v54 = vshll.u32 %v1231_v49, 16 }
 0x165   : > { %v646_v53 = vrot.slane %v644_v51, 7  ;;  %v1232_v55 = vpack.c.bf16 %v636_v52, %v636_v52 }
 0x167   : > { %v649_v56 = vor.u32 %v647_v54, %v646_v53  ;;  %v652_v57 = vshrl.u32 %v1232_v55, 16  ;;  %v655_v60 = vshll.u32 %v1232_v55, 16  ;;  %v650_v62 = vrot.slane %v646_v53, 4 }
 0x169   : > { %v663_v58 = vsel %vm1910_vm9, %v649_v56, %v1926_v44  ;;  %v654_v59 = vrot.slane %v652_v57, 7 }
 0x16a   : > { %664 = vst [vmem:[#allocation2] sm:$0xf] %v663_v58 }
 0x16b   : > { %v657_v63 = vor.u32 %v655_v60, %v654_v59  ;;  %v659_v1 = vrot.slane %v654_v59, 4 }
 0x16d   : > { %v658_v2 = vsel %vm1904_vm8, %v650_v62, %v657_v63  ;;  %v667_v3 = vsel %vm1875_vm4, %v659_v1, %v666_v61 }
 0x16e   : > { %665 = vst [vmem:[#allocation2 + $0x4] sm:$0xf] %v658_v2  ;;  %668 = vst [vmem:[#allocation2 + $0x8] sm:$0x1] %v667_v3 }
 0x171   : > { %v669_v4 = vld [vmem:[#allocation2] sm:$0xf] }
 0x172   : > { %v906_v21 = vld [vmem:[#allocation2] sm:$0xe] }
 0x175   : > { %v670_v5 = vld [vmem:[#allocation2 + $0x4] sm:$0xf]  ;;  %v1527_v29 = vld [vmem:[#allocation2 + $0x8] ss:$0 sps:$4 sm:$0x11]  }
 0x176   : > { %v1194_v6 = vcombine.low %v669_v4, %v670_v5  ;;  %v722_v7 = vshll.u32 %v1527_v29, 16  ;;  %v1212_v22 = vcombine.low %v906_v21, %v670_v5  ;;  %v928_v26 = vrot.slane %v1527_v29, 1 }
 0x178   : > { %1385 = vmatmul.mubr.bf16.vlgmr.msra.gmra.mxu0 %v1194_v6  ;;  %v717_v44 = vshll.u32 %v1194_v6, 16  ;;  %v715_v8 = vshrl.u32 %v1194_v6, 16  ;;  %v724_v12 = vrot.slane %v722_v7, 1  ;;  %v927_v24 = vrot.slane %v1212_v22, 1 }
 0x17a   : > { %v719_v10 = vrot.slane %v717_v44, 1  ;;  %v929_v27 = vsel %vm525_vm11, %v927_v24, %v928_v26 }
 0x17c   : > { %v720_v11 = vor.u32 %v719_v10, %v715_v8 }
 0x17e   : > { %v725_v25 = vsel %vm311_vm10, %v720_v11, %v724_v12 }
 0x17f   : > { %1365 = vmatmul.mubr.bf16.vlgmr.msra.gmra.mxu1 %v725_v25 }
 0x180   : > { %1389 = vmatpush3.bf16.msra.mxu1 %v1528_v13  ;;  %1404 = vmatprep.mubr.msk.bf16.mxu1 %vm1695_vm0, %v1694_v0 }
 0x181   : > { %1390 = vmatprep.subr.bf16.mxu1 %v1694_v0 }
 0x184   : > { %1391 = vmatpush3.bf16.msra.mxu1 %v1529_v9 }
 0x185   : > { %1392 = vmatprep.subr.bf16.mxu1 %v1694_v0 }
 0x188   : > { %1393 = vmatpush3.bf16.msra.mxu1 %v1530_v14 }
 0x189   : > { %1394 = vmatprep.subr.bf16.mxu1 %v1694_v0 }
 0x18c   : > { %1395 = vmatpush3.bf16.msra.mxu1 %v1531_v16 }
 0x18d   : > { %1396 = vmatprep.subr.bf16.mxu1 %v1694_v0 }
 0x190   : > { %1397 = vmatpush3.bf16.msra.mxu1 %v1532_v17 }
 0x191   : > { %1398 = vmatprep.subr.bf16.mxu1 %v1694_v0 }
 0x194   : > { %1399 = vmatpush3.bf16.msra.mxu1 %v1533_v18 }
 0x195   : > { %1400 = vmatprep.subr.bf16.mxu1 %v1694_v0 }
 0x198   : > { %1401 = vmatpush3.bf16.msra.mxu1 %v1534_v20 }
 0x199   : > { %1402 = vmatprep.subr.bf16.mxu1 %v1694_v0 }
 0x19c   : > { %1403 = vmatpush3.bf16.msra.mxu1 %v1535_v23 }
 0x19f   : > { %1405 = vmatmul.mubr.bf16.vlgmr.msra.gmra.mxu1 %v929_v27 }
 0x238   : > { %v899_v28 = vpop.f32.mrf.mxu0 }
 0x23a   : > { %v1386_v30 = vpop.f32.mrf.mxu0 }
 0x23c   : > { %v902_v31 = vpop.f32.mrf.mxu0 }
 0x23e   : > { %v1387_v32 = vpop.f32.mrf.mxu0 }
 0x23f   : > { %v809_v33 = vpop.f32.mrf.mxu1 }
 0x240   : > { %v900_v37 = vadd.f32 %v899_v28, %v809_v33 }
 0x241   : > { %v1366_v34 = vpop.f32.mrf.mxu1 }
 0x243   : > { %v812_v35 = vpop.f32.mrf.mxu1 }
 0x244   : > { %v903_v42 = vadd.f32 %v902_v31, %v812_v35 }
 0x245   : > { %v1367_v36 = vpop.f32.mrf.mxu1 }
 0x25f   : > { %v1013_v38 = vpop.f32.mrf.mxu1 }
 0x260   : > { %v1020_v0 = vadd.f32 %v1013_v38, %v900_v37 }
 0x261   : > { %v1406_v41 = vpop.f32.mrf.mxu1 }
 0x262   : > { %v1027_v43 = vmul.f32 %v1221_v39, %v1020_v0 }
 0x263   : > { %v1016_v45 = vpop.f32.mrf.mxu1 }
 0x264   : > { %v1034_v46 = vadd.f32 %v1222_v40, %v1027_v43  ;;  %v1021_v47 = vadd.f32 %v1016_v45, %v903_v42 }
 0x265   : > { %v1407_v48 = vpop.f32.mrf.mxu1 }
 0x266   : > { %v1036_v49 = vadd.f32 %v1034_v46, %v1887_v15  ;;  %v1028_v50 = vmul.f32 %v1221_v39, %v1021_v47 }
 0x268   : > { %v1038_v51 = vmax.f32 %v1036_v49, 0.0  ;;  %v1035_v52 = vadd.f32 %v1222_v40, %v1028_v50 }
 0x26a   : > { %1040 = vst [vmem:[%s215_s20] sm:$0xff] %v1038_v51  ;;  %v1037_v53 = vadd.f32 %v1035_v52, %v1894_v19 }
 0x26c   : > { %v1039_v15 = vmax.f32 %v1037_v53, 0.0 }
 0x26e   : > { %1041 = vst [vmem:[%s215_s20 + $0x8] sm:$0xff] %v1039_v15 }
 0x26f   : > { %1630 = shalt.err (!%p1627_p9)
}
 0x270   : > { %s1631_s22 = scalar_lea.hbm %s1986_s29, 256  ;;  %s1635_s26 = scalar_lea.hbm %s2034_s3, 512 }
 0x271   : > { %p1632_p13 = scmp.ne.s32.totalorder %s1986_s29, %s1631_s22  ;;  %p1636_p4 = scmp.lt.s32.totalorder %s1986_s29, %s2034_s3 }
 0x272   : > { %p1637_p8 = scmp.lt.s32.totalorder %s1635_s26, %s1631_s22 }
 0x273   : > { %p1633_p5 = pnand %p1632_p13, %p2058_p10 }
 0x274   : > { %p1638_p3 = por %p1637_p8, %p1636_p4 }
 0x275   : > { %p1634_p0 = pneg %p1633_p5 }
 0x277   : > { %p1639_p11 = pnand %p1638_p3, %p1634_p0 }
 0x279   : > { %1642 = shalt.err (!%p1639_p11)
}
 0x27a   : > { %s1697_s6 = smov 128   ;;  %s1698_s18 = smov 8  }
 0x27b   : > { %1418 = dma.vmem_to_hbm [thread:$0]  (%p2058_p10), %s1988_s25, 256, %s1986_s29, %s1043_s8, %s1697_s6, %s1697_s6, %s1698_s18  }
 0x27c PF: > { %s1071_s20 = sand.u32 1, %s1673_s12   ;;  %p2059_p1 = scmp.ne.s32.totalorder %s2040_s19, 0 }
 0x27d   : > { %p2060_p2 = scmp.ge.s32.totalorder %s1685_s15, 2  ;;  %s1072_s27 = scalar_lea.sflag [#allocation5], %s1071_s20 }
 0x27f   : > { %p1432_p6 = pnand %p2060_p2, %p2059_p1 }
 0x281   : > { %p1433_p12 = pneg %p1432_p6 }
 0x283   : > { %1668 = dma.done.wait (%p1433_p12), %s1072_s27, 256  }
 0x284   : > { %1670 = vsyncadd (%p1433_p12), %s1072_s27, 4294967040  ;;  %p17_p7 = scmp.ge.s32.totalorder %s1791_s7, 4   ;;  %s2061_s12 = smov %s1677_s13 }
 0x285   : > { %s2062_s13 = smov %s1681_s14  ;;  %s2063_s14 = smov %s1807_s11 }
 0x286   : > { %s2064_s15 = smov %s1791_s7  ;;  %19 = sbr.rel (!%p17_p7) target bundleno = 6 (0x6), region = 90 }
 0x28b   :  { %1077 = vsyncpa [#allocation4], 1 }
 0x28c   :  { %1079 = vsyncpa [#allocation4 + $0x1], 1 }
 0x28d   :  { %1080 = vsyncpa [#allocation7], 1 }
 0x28e   :  { %1081 = vsyncpa [#allocation5], 1 }
 0x28f   :  { %1083 = vsyncpa [#allocation5 + $0x1], 1 }

</bundles_post_ra>
